<compile_context>
chip_gen: v7x
topology: tpu7x:2x2x1
jax: 0.10.0
libtpu: 0.0.40
codegen_flags: <defaults>
</compile_context>

<pallas_src>
import jax
import jax.numpy as jnp
from jax.experimental import pallas as pl
from jax.experimental.pallas import tpu as pltpu

C_IN = 768  # fixed by the module (nn.Linear(768, dim) / nn.Linear(dim, 768))


def _round_up(v, m):
    return (v + m - 1) // m * m


def _vmem_capacity_bytes(default=64 * 1024 * 1024):
    # v7x: 64 MiB per TensorCore, v5e/v6e: 128 MiB.  Fall back to the conservative 64 MiB.
    try:
        cap = getattr(pltpu.get_tpu_info(), "vmem_capacity_bytes", None)
        if cap:
            return int(cap)
    except Exception:
        pass
    return default


def adapter_kernel(x_ref, wd_ref, wu_ref, o_ref):
    # x_ref : (tm, 768)   tile of flattened tokens
    # wd_ref: (768, dim)  adapter_down.weight^T, pre-transposed to (K, N) MXU layout, resident
    # wu_ref: (dim, 768)  adapter_up.weight^T,   pre-transposed to (K, N) MXU layout, resident
    # o_ref : (tm, 768)   lane-dense output tile (768 = 6 * 128)
    x = x_ref[...]
    # Down-projection: (tm, 768) @ (768, dim) -> (tm, dim), f32 accumulation on the MXU.
    h = jnp.dot(x, wd_ref[...], preferred_element_type=jnp.float32)
    h = jnp.maximum(h, 0.0)  # ReLU
    # Dropout(p=0.1): identity in eval mode (no masking / scaling).
    # TODO(synk): training-mode dropout (pltpu.prng_random_bits mask + 1/(1-p) scale)
    #             and the perturb_forward path are not emitted.
    h = h.astype(wu_ref.dtype)
    # Up-projection: (tm, dim) @ (dim, 768) -> (tm, 768), f32 accumulation on the MXU.
    out = jnp.dot(h, wu_ref[...], preferred_element_type=jnp.float32)
    o_ref[...] = out.astype(o_ref.dtype)


def adapter_forward(x, w_down, w_up, *, tm=None, compute_dtype=jnp.bfloat16):
    """Fused AdaptFormer Adapter forward: ReLU(x @ W_down^T) @ W_up^T  (eval mode).

    x      : (B, N, 768)
    w_down : (dim, 768)  -- adapter_down.weight (PyTorch nn.Linear layout, bias=False)
    w_up   : (768, dim)  -- adapter_up.weight   (PyTorch nn.Linear layout, bias=False)
    tm     : row tile (auto-chosen from VMEM capacity if None; rounded to a multiple of 8)
    compute_dtype : operand & output dtype.  bf16 by default (this kernel is HBM-bound on
        all TPU generations: arithmetic intensity ~dim flop/byte << ridge point), f32 MXU
        accumulation is kept in all cases.  Pass jnp.float32 (or None) for exact f32 I/O.
    """
    B, N, C = x.shape
    assert C == C_IN, f"expected channel dim {C_IN}, got {C}"
    dim, c_in = w_down.shape
    assert c_in == C_IN and w_up.shape == (C_IN, dim)

    # One-time transpose of the tiny weights into (K, N) MXU layout.  A <=768x64 transpose
    # outside the kernel is negligible and removes per-grid-step relayout work inside it.
    wd_t = jnp.transpose(w_down)   # (768, dim)
    wu_t = jnp.transpose(w_up)     # (dim, 768)

    if compute_dtype is not None:
        x = x.astype(compute_dtype)
        wd_t = wd_t.astype(compute_dtype)
        wu_t = wu_t.astype(compute_dtype)

    M = B * N
    x2 = x.reshape(M, C)
    act_item = jnp.dtype(x2.dtype).itemsize
    w_item = jnp.dtype(wd_t.dtype).itemsize

    vmem_cap = _vmem_capacity_bytes()

    # Row tile: multiple of 8 sublanes; big tiles amortize the ~0.35 us/step grid overhead.
    if tm is None:
        tm = 2048 if vmem_cap >= (100 << 20) else 1024
    tm = max(8, min(int(tm), _round_up(M, 8)))
    tm = _round_up(tm, 8)

    # Ragged M: grid = cdiv(M, tm); Pallas masks the boundary block's out-of-range writes,
    # so no jnp.pad of the input and no output slice (each would be a full extra HBM pass).
    # This is safe here because the op is purely row-wise (no cross-row reduction).
    grid = pl.cdiv(M, tm)

    # VMEM budget: double-buffered x/out tiles, resident (lane-padded) weights, and the
    # kernel's f32 intermediates (h and the up-projection accumulator).
    dim_lane = max(_round_up(dim, 128), 128)
    dim_sub = _round_up(dim, 8)
    est = (2 * tm * C * act_item              # x tile (double-buffered)
           + 2 * tm * C * act_item            # out tile (double-buffered)
           + 2 * C * dim_lane * w_item        # W_down^T (resident, lane-padded)
           + 2 * dim_sub * C * w_item         # W_up^T   (resident)
           + tm * C * 4 + tm * dim_lane * 4)  # f32 intermediates inside the kernel
    # Cap at 3/4 of physical VMEM: 48 MiB on v7x (64 MiB/TC), 96 MiB on v5e/v6e (128 MiB).
    vmem_limit = int(min(vmem_cap * 3 // 4, max(32 << 20, est * 3 // 2)))

    out2 = pl.pallas_call(
        adapter_kernel,
        out_shape=jax.ShapeDtypeStruct((M, C), x2.dtype),
        grid_spec=pltpu.PrefetchScalarGridSpec(
            num_scalar_prefetch=0,
            grid=(grid,),
            in_specs=[
                pl.BlockSpec((tm, C), lambda i: (i, 0)),
                pl.BlockSpec((C, dim), lambda i: (0, 0)),   # W_down^T, resident
                pl.BlockSpec((dim, C), lambda i: (0, 0)),   # W_up^T,   resident
            ],
            out_specs=pl.BlockSpec((tm, C), lambda i: (i, 0)),
        ),
        compiler_params=pltpu.CompilerParams(
            dimension_semantics=("parallel",),
            vmem_limit_bytes=vmem_limit),
    )(x2, wd_t, wu_t)

    return out2.reshape(B, N, C)


def reference_forward(x, w_down, w_up):
    h = jnp.maximum(jnp.einsum("bnc,dc->bnd", x, w_down), 0.0)
    return jnp.einsum("bnd,cd->bnc", h, w_up)


def _make_inputs(key, B, N, dim):
    k_x, k_wd, k_wu = jax.random.split(key, 3)
    x = jax.random.normal(k_x, (B, N, C_IN), dtype=jnp.float32)
    bound_d = 1.0 / (C_IN ** 0.5)
    w_down = jax.random.uniform(k_wd, (dim, C_IN), dtype=jnp.float32,
                                minval=-bound_d, maxval=bound_d)
    bound_u = 1.0 / (dim ** 0.5)
    w_up = jax.random.uniform(k_wu, (C_IN, dim), dtype=jnp.float32,
                              minval=-bound_u, maxval=bound_u)
    return x, w_down, w_up


if __name__ == "__main__":
    key = jax.random.PRNGKey(0)
    k1, k2 = jax.random.split(key, 2)

    # --- Test 1: small shape, explicit f32 path, single tile, tight tolerance ------
    B, N, dim = 2, 8, 32
    x, w_down, w_up = _make_inputs(k1, B, N, dim)
    out = jax.block_until_ready(
        adapter_forward(x, w_down, w_up, compute_dtype=jnp.float32))
    ref = reference_forward(x, w_down, w_up)
    assert out.shape == (B, N, C_IN)
    assert jnp.allclose(out, ref, atol=1e-4, rtol=1e-4)

    # --- Test 2: ViT-like sequence (M=394 not divisible by tm), ragged boundary,
    #             default bf16 compute path, looser tolerance -----------------------
    B2, N2, dim2 = 2, 197, 64
    x2, w_down2, w_up2 = _make_inputs(k2, B2, N2, dim2)
    out2 = jax.block_until_ready(adapter_forward(x2, w_down2, w_up2, tm=128))
    ref2 = reference_forward(x2, w_down2, w_up2)
    assert out2.shape == (B2, N2, C_IN)
    assert out2.dtype == jnp.bfloat16
    assert jnp.allclose(out2.astype(jnp.float32), ref2, atol=5e-2, rtol=5e-2)

    # --- Test 3: same ragged shape, f32 path, auto tile size ------------------------
    out3 = jax.block_until_ready(
        adapter_forward(x2, w_down2, w_up2, compute_dtype=jnp.float32))
    assert jnp.allclose(out3, ref2, atol=1e-4, rtol=1e-4)

    print("KERNEL_OK")
</pallas_src>

<mosaic_0001>
module attributes {stable_mosaic.version = 11 : i64} {
  func.func @adapter_kernel(%arg0: i32, %arg1: memref<16x768xf32, #tpu.memory_space<vmem>>, %arg2: memref<768x32xf32, #tpu.memory_space<vmem>>, %arg3: memref<32x768xf32, #tpu.memory_space<vmem>>, %arg4: memref<16x768xf32, #tpu.memory_space<vmem>>) attributes {dimension_semantics = [#tpu.dimension_semantics<parallel>], iteration_bounds = array<i64: 1>, scalar_prefetch = 0 : i64, scratch_operands = 0 : i64, tpu.core_type = #tpu.core_type<tc>, window_params = [{transform_indices = @transform_0, window_bounds = array<i64: 16, 768>}, {pipeline_mode = #tpu.pipeline_mode<synchronous>, transform_indices = @transform_1, window_bounds = array<i64: 768, 32>}, {pipeline_mode = #tpu.pipeline_mode<synchronous>, transform_indices = @transform_2, window_bounds = array<i64: 32, 768>}, {transform_indices = @transform_3, window_bounds = array<i64: 16, 768>}]} {
    %c0 = arith.constant 0 : index
    %c0_0 = arith.constant 0 : index
    %0 = vector.load %arg1[%c0, %c0_0] : memref<16x768xf32, #tpu.memory_space<vmem>>, vector<16x768xf32>
    %c0_1 = arith.constant 0 : index
    %c0_2 = arith.constant 0 : index
    %1 = vector.load %arg2[%c0_1, %c0_2] : memref<768x32xf32, #tpu.memory_space<vmem>>, vector<768x32xf32>
    %cst = arith.constant dense<0.000000e+00> : vector<16x32xf32>
    %2 = tpu.matmul %0, %1, %cst {dimension_numbers = #tpu.dot_dimension_numbers<[1], [0], [0], [1], [0, 0, 1, 1], [], []>} : vector<16x768xf32>, vector<768x32xf32>, vector<16x32xf32> -> vector<16x32xf32>
    %cst_3 = arith.constant 0.000000e+00 : f32
    %3 = vector.broadcast %cst_3 : f32 to vector<16x32xf32>
    %4 = arith.maximumf %2, %3 : vector<16x32xf32>
    %c0_4 = arith.constant 0 : index
    %c0_5 = arith.constant 0 : index
    %5 = vector.load %arg3[%c0_4, %c0_5] : memref<32x768xf32, #tpu.memory_space<vmem>>, vector<32x768xf32>
    %cst_6 = arith.constant dense<0.000000e+00> : vector<16x768xf32>
    %6 = tpu.matmul %4, %5, %cst_6 {dimension_numbers = #tpu.dot_dimension_numbers<[1], [0], [0], [1], [0, 0, 1, 1], [], []>} : vector<16x32xf32>, vector<32x768xf32>, vector<16x768xf32> -> vector<16x768xf32>
    %c0_7 = arith.constant 0 : index
    %c0_8 = arith.constant 0 : index
    %7 = vector.load %arg4[%c0_7, %c0_8] : memref<16x768xf32, #tpu.memory_space<vmem>>, vector<16x768xf32>
    tpu.vector_store %arg4[%c0_7, %c0_8], %6 {strides = array<i32>} : memref<16x768xf32, #tpu.memory_space<vmem>>, vector<16x768xf32>,
    return
  }
  func.func @transform_0(%arg0: i32) -> (i32, i32) {
    %c0_i32 = arith.constant 0 : i32
    %c0_i32_0 = arith.constant 0 : i32
    return %arg0, %c0_i32 : i32, i32
  }
  func.func @transform_1(%arg0: i32) -> (i32, i32) {
    %c0_i32 = arith.constant 0 : i32
    %c0_i32_0 = arith.constant 0 : i32
    %c0_i32_1 = arith.constant 0 : i32
    return %c0_i32, %c0_i32_0 : i32, i32
  }
  func.func @transform_2(%arg0: i32) -> (i32, i32) {
    %c0_i32 = arith.constant 0 : i32
    %c0_i32_0 = arith.constant 0 : i32
    %c0_i32_1 = arith.constant 0 : i32
    return %c0_i32, %c0_i32_0 : i32, i32
  }
  func.func @transform_3(%arg0: i32) -> (i32, i32) {
    %c0_i32 = arith.constant 0 : i32
    %c0_i32_0 = arith.constant 0 : i32
    return %arg0, %c0_i32 : i32, i32
  }
}

</mosaic_0001>

<bundles_post_ra>
// kernel: tpu_custom_call.1
= control target key start
LH: loop header
LB: loop body
LE: loop exit
PB: predicated region body
PF: predicated region fallthrough
CT: control target
= control target key end

     0   :  { %s1352_s0 = inlined_call_operand.vmem [shape: f32[16,768], index: 0, kind: input, shape index: {}]   ;;  %s1353_s1 = inlined_call_operand.vmem [shape: f32[768,32], index: 1, kind: input, shape index: {}]   ;;  %s1354_s2 = inlined_call_operand.vmem [shape: f32[32,768], index: 2, kind: input, shape index: {}]   ;;  %s1355_s3 = inlined_call_operand.hbm [shape: f32[16,768], index: 3, kind: output, shape index: {}]  }
   0x1   :  { %v43_v0 = vld [vmem:[%s1353_s1 + $0x80] sm:$0xff]  ;;  %v44_v1 = vld [vmem:[%s1353_s1 + $0x88] sm:$0xff]  ;;  %v45_v11 = vld [vmem:[%s1353_s1 + $0x90] sm:$0xff] }
   0x2   :  { %v75_v2 = vld [vmem:[%s1353_s1 + $0x180] sm:$0xff]  ;;  %v760_v3 = vpack.c.bf16 %v44_v1, %v43_v0  ;;  %v76_v4 = vld [vmem:[%s1353_s1 + $0x188] sm:$0xff]  ;;  %v46_v13 = vld [vmem:[%s1353_s1 + $0x98] sm:$0xff] }
   0x3   :  { %v27_v5 = vld [vmem:[%s1353_s1] sm:$0xff]  ;;  %v28_v6 = vld [vmem:[%s1353_s1 + $0x8] sm:$0xff]  ;;  %v792_v7 = vpack.c.bf16 %v76_v4, %v75_v2  ;;  %v77_v14 = vld [vmem:[%s1353_s1 + $0x190] sm:$0xff]  ;;  %v764_v16 = vpack.c.bf16 %v46_v13, %v45_v11 }
   0x4   :  { %v762_v8 = vpack.c.bf16 %v28_v6, %v27_v5  ;;  %v59_v9 = vld [vmem:[%s1353_s1 + $0x100] sm:$0xff]  ;;  %v60_v10 = vld [vmem:[%s1353_s1 + $0x108] sm:$0xff]  ;;  %761 = vmatprep.subr.bf16.mxu0 %v760_v3  ;;  %v78_v15 = vld [vmem:[%s1353_s1 + $0x198] sm:$0xff] }
   0x5   :  { %v794_v12 = vpack.c.bf16 %v60_v10, %v59_v9  ;;  %793 = vmatprep.subr.bf16.mxu1 %v792_v7  ;;  %v796_v17 = vpack.c.bf16 %v78_v15, %v77_v14  ;;  %v29_v18 = vld [vmem:[%s1353_s1 + $0x10] sm:$0xff]  ;;  %v30_v19 = vld [vmem:[%s1353_s1 + $0x18] sm:$0xff]  ;;  %v47_v23 = vld [vmem:[%s1353_s1 + $0xa0] sm:$0xff] }
   0x6   :  { %763 = vmatpush3.bf16.msra.mxu0 %v762_v8  ;;  %v61_v20 = vld [vmem:[%s1353_s1 + $0x110] sm:$0xff]  ;;  %v766_v21 = vpack.c.bf16 %v30_v19, %v29_v18  ;;  %v62_v22 = vld [vmem:[%s1353_s1 + $0x118] sm:$0xff]  ;;  %v48_v24 = vld [vmem:[%s1353_s1 + $0xa8] sm:$0xff] }
   0x7   :  { %795 = vmatpush3.bf16.msra.mxu1 %v794_v12  ;;  %765 = vmatprep.subr.bf16.mxu0 %v764_v16  ;;  %v798_v25 = vpack.c.bf16 %v62_v22, %v61_v20  ;;  %v768_v26 = vpack.c.bf16 %v48_v24, %v47_v23  ;;  %v79_v27 = vld [vmem:[%s1353_s1 + $0x1a0] sm:$0xff]  ;;  %v80_v28 = vld [vmem:[%s1353_s1 + $0x1a8] sm:$0xff]  ;;  %v49_v35 = vld [vmem:[%s1353_s1 + $0xb0] sm:$0xff] }
   0x8   :  { %797 = vmatprep.subr.bf16.mxu1 %v796_v17  ;;  %v31_v29 = vld [vmem:[%s1353_s1 + $0x20] sm:$0xff]  ;;  %v800_v30 = vpack.c.bf16 %v80_v28, %v79_v27  ;;  %v32_v31 = vld [vmem:[%s1353_s1 + $0x28] sm:$0xff]  ;;  %v50_v36 = vld [vmem:[%s1353_s1 + $0xb8] sm:$0xff] }
   0x9   :  { %v63_v32 = vld [vmem:[%s1353_s1 + $0x120] sm:$0xff]  ;;  %v64_v33 = vld [vmem:[%s1353_s1 + $0x128] sm:$0xff]  ;;  %v770_v34 = vpack.c.bf16 %v32_v31, %v31_v29  ;;  %v81_v37 = vld [vmem:[%s1353_s1 + $0x1b0] sm:$0xff]  ;;  %v772_v39 = vpack.c.bf16 %v50_v36, %v49_v35 }
   0xa   :  { %767 = vmatpush3.bf16.msra.mxu0 %v766_v21  ;;  %v802_v38 = vpack.c.bf16 %v64_v33, %v63_v32  ;;  %v82_v40 = vld [vmem:[%s1353_s1 + $0x1b8] sm:$0xff]  ;;  %v33_v41 = vld [vmem:[%s1353_s1 + $0x30] sm:$0xff]  ;;  %v51_v46 = vld [vmem:[%s1353_s1 + $0xc0] sm:$0xff] }
   0xb   :  { %799 = vmatpush3.bf16.msra.mxu1 %v798_v25  ;;  %769 = vmatprep.subr.bf16.mxu0 %v768_v26  ;;  %v34_v42 = vld [vmem:[%s1353_s1 + $0x38] sm:$0xff]  ;;  %v804_v43 = vpack.c.bf16 %v82_v40, %v81_v37  ;;  %v65_v44 = vld [vmem:[%s1353_s1 + $0x130] sm:$0xff]  ;;  %v52_v47 = vld [vmem:[%s1353_s1 + $0xc8] sm:$0xff] }
   0xc   :  { %801 = vmatprep.subr.bf16.mxu1 %v800_v30  ;;  %v66_v45 = vld [vmem:[%s1353_s1 + $0x138] sm:$0xff]  ;;  %v83_v48 = vld [vmem:[%s1353_s1 + $0x1c0] sm:$0xff]  ;;  %v84_v49 = vld [vmem:[%s1353_s1 + $0x1c8] sm:$0xff]  ;;  %v774_v50 = vpack.c.bf16 %v34_v42, %v33_v41  ;;  %v776_v52 = vpack.c.bf16 %v52_v47, %v51_v46 }
   0xd   :  { %v806_v51 = vpack.c.bf16 %v66_v45, %v65_v44  ;;  %v35_v53 = vld [vmem:[%s1353_s1 + $0x40] sm:$0xff]  ;;  %v36_v54 = vld [vmem:[%s1353_s1 + $0x48] sm:$0xff]  ;;  %v808_v56 = vpack.c.bf16 %v84_v49, %v83_v48  ;;  %v53_v58 = vld [vmem:[%s1353_s1 + $0xd0] sm:$0xff] }
   0xe   :  { %771 = vmatpush3.bf16.msra.mxu0 %v770_v34  ;;  %v67_v55 = vld [vmem:[%s1353_s1 + $0x140] sm:$0xff]  ;;  %v68_v57 = vld [vmem:[%s1353_s1 + $0x148] sm:$0xff]  ;;  %v54_v59 = vld [vmem:[%s1353_s1 + $0xd8] sm:$0xff]  ;;  %v778_v62 = vpack.c.bf16 %v36_v54, %v35_v53 }
   0xf   :  { %803 = vmatpush3.bf16.msra.mxu1 %v802_v38  ;;  %773 = vmatprep.subr.bf16.mxu0 %v772_v39  ;;  %v85_v60 = vld [vmem:[%s1353_s1 + $0x1d0] sm:$0xff]  ;;  %v86_v61 = vld [vmem:[%s1353_s1 + $0x1d8] sm:$0xff]  ;;  %v810_v63 = vpack.c.bf16 %v68_v57, %v67_v55  ;;  %v780_v0 = vpack.c.bf16 %v54_v59, %v53_v58  ;;  %v55_v6 = vld [vmem:[%s1353_s1 + $0xe0] sm:$0xff] }
  0x10   :  { %805 = vmatprep.subr.bf16.mxu1 %v804_v43  ;;  %v37_v1 = vld [vmem:[%s1353_s1 + $0x50] sm:$0xff]  ;;  %v38_v2 = vld [vmem:[%s1353_s1 + $0x58] sm:$0xff]  ;;  %v812_v4 = vpack.c.bf16 %v86_v61, %v85_v60  ;;  %v56_v7 = vld [vmem:[%s1353_s1 + $0xe8] sm:$0xff] }
  0x11   :  { %v69_v3 = vld [vmem:[%s1353_s1 + $0x150] sm:$0xff]  ;;  %v70_v5 = vld [vmem:[%s1353_s1 + $0x158] sm:$0xff]  ;;  %v87_v8 = vld [vmem:[%s1353_s1 + $0x1e0] sm:$0xff]  ;;  %v782_v10 = vpack.c.bf16 %v38_v2, %v37_v1  ;;  %v784_v14 = vpack.c.bf16 %v56_v7, %v55_v6 }
  0x12   :  { %775 = vmatpush3.bf16.msra.mxu0 %v774_v50  ;;  %v88_v9 = vld [vmem:[%s1353_s1 + $0x1e8] sm:$0xff]  ;;  %v39_v11 = vld [vmem:[%s1353_s1 + $0x60] sm:$0xff]  ;;  %v814_v13 = vpack.c.bf16 %v70_v5, %v69_v3  ;;  %v18_v17 = vld [vmem:[%s1352_s0 + $0x18] sm:$0xff] }
  0x13   :  { %807 = vmatpush3.bf16.msra.mxu1 %v806_v51  ;;  %777 = vmatprep.subr.bf16.mxu0 %v776_v52  ;;  %v40_v12 = vld [vmem:[%s1353_s1 + $0x68] sm:$0xff]  ;;  %v71_v15 = vld [vmem:[%s1353_s1 + $0x160] sm:$0xff]  ;;  %v816_v18 = vpack.c.bf16 %v88_v9, %v87_v8  ;;  %v57_v20 = vld [vmem:[%s1353_s1 + $0xf0] sm:$0xff] }
  0x14   :  { %809 = vmatprep.subr.bf16.mxu1 %v808_v56  ;;  %v16_v16 = vld [vmem:[%s1352_s0 + $0x8] sm:$0xff]  ;;  %v58_v21 = vld [vmem:[%s1353_s1 + $0xf8] sm:$0xff]  ;;  %v89_v22 = vld [vmem:[%s1353_s1 + $0x1f0] sm:$0xff]  ;;  %262 = vmatprep.mubr.f32.mxu1 %v18_v17  ;;  %v786_v24 = vpack.c.bf16 %v40_v12, %v39_v11 }
  0x15   :  { %v72_v19 = vld [vmem:[%s1353_s1 + $0x168] sm:$0xff]  ;;  %187 = vmatprep.mubr.f32.mxu0 %v16_v16  ;;  %v90_v23 = vld [vmem:[%s1353_s1 + $0x1f8] sm:$0xff]  ;;  %v788_v26 = vpack.c.bf16 %v58_v21, %v57_v20  ;;  %v41_v27 = vld [vmem:[%s1353_s1 + $0x70] sm:$0xff] }
  0x16   :  { %779 = vmatpush3.bf16.msra.mxu0 %v778_v62  ;;  %v818_v25 = vpack.c.bf16 %v72_v19, %v71_v15  ;;  %v42_v28 = vld [vmem:[%s1353_s1 + $0x78] sm:$0xff]  ;;  %v73_v29 = vld [vmem:[%s1353_s1 + $0x170] sm:$0xff]  ;;  %v820_v30 = vpack.c.bf16 %v90_v23, %v89_v22  ;;  %v107_v32 = vld [vmem:[%s1353_s1 + $0x280] sm:$0xff] }
  0x17   :  { %811 = vmatpush3.bf16.msra.mxu1 %v810_v63  ;;  %781 = vmatprep.subr.bf16.mxu0 %v780_v0  ;;  %v74_v31 = vld [vmem:[%s1353_s1 + $0x178] sm:$0xff]  ;;  %v108_v33 = vld [vmem:[%s1353_s1 + $0x288] sm:$0xff]  ;;  %v790_v34 = vpack.c.bf16 %v42_v28, %v41_v27  ;;  %v91_v37 = vld [vmem:[%s1353_s1 + $0x200] sm:$0xff] }
  0x18   :  { %813 = vmatprep.subr.bf16.mxu1 %v812_v4  ;;  %v822_v35 = vpack.c.bf16 %v74_v31, %v73_v29  ;;  %v824_v36 = vpack.c.bf16 %v108_v33, %v107_v32  ;;  %v92_v38 = vld [vmem:[%s1353_s1 + $0x208] sm:$0xff]  ;;  %v109_v39 = vld [vmem:[%s1353_s1 + $0x290] sm:$0xff]  ;;  %v110_v40 = vld [vmem:[%s1353_s1 + $0x298] sm:$0xff] }
  0x19   :  { %v15_v41 = vld [vmem:[%s1352_s0] sm:$0xff]  ;;  %v826_v42 = vpack.c.bf16 %v92_v38, %v91_v37  ;;  %v17_v43 = vld [vmem:[%s1352_s0 + $0x10] sm:$0xff]  ;;  %v828_v44 = vpack.c.bf16 %v110_v40, %v109_v39  ;;  %v94_v46 = vld [vmem:[%s1353_s1 + $0x218] sm:$0xff] }
  0x1a   :  { %783 = vmatpush3.bf16.msra.mxu0 %v782_v10  ;;  %v93_v45 = vld [vmem:[%s1353_s1 + $0x210] sm:$0xff]  ;;  %v111_v47 = vld [vmem:[%s1353_s1 + $0x2a0] sm:$0xff]  ;;  %v112_v48 = vld [vmem:[%s1353_s1 + $0x2a8] sm:$0xff] }
  0x1b   :  { %815 = vmatpush3.bf16.msra.mxu1 %v814_v13  ;;  %785 = vmatprep.subr.bf16.mxu0 %v784_v14  ;;  %v22_v49 = vld [vmem:[%s1352_s0 + $0x38] sm:$0xff]  ;;  %v24_v50 = vld [vmem:[%s1352_s0 + $0x48] sm:$0xff]  ;;  %v830_v51 = vpack.c.bf16 %v94_v46, %v93_v45  ;;  %v21_v52 = vld [vmem:[%s1352_s0 + $0x30] sm:$0xff] }
  0x1c   :  { %817 = vmatprep.subr.bf16.mxu1 %v816_v18 }
  0x1e   :  { %787 = vmatpush3.bf16.msra.mxu0 %v786_v24 }
  0x1f   :  { %819 = vmatpush3.bf16.msra.mxu1 %v818_v25  ;;  %789 = vmatprep.subr.bf16.mxu0 %v788_v26 }
  0x20   :  { %821 = vmatprep.subr.bf16.mxu1 %v820_v30 }
  0x22   :  { %791 = vmatpush3.bf16.msra.mxu0 %v790_v34 }
  0x23   :  { %823 = vmatpush3.bf16.msra.mxu1 %v822_v35  ;;  %825 = vmatprep.subr.bf16.mxu0 %v824_v36 }
  0x25   :  { %188 = vmatmul.mubr.f32.vlgmr.msra.gmra.mrb[0].mxu0 %v15_v41 }
  0x26   :  { %263 = vmatmul.mubr.f32.vlgmr.msra.gmra.mrb[0].mxu1 %v17_v43  ;;  %827 = vmatpush3.bf16.msra.mxu0 %v826_v42 }
  0x27   :  { %8 = vsyncpa [#allocation3], 0  ;;  %829 = vmatprep.subr.bf16.mxu0 %v828_v44  ;;  %v832_v53 = vpack.c.bf16 %v112_v48, %v111_v47  ;;  %v95_v54 = vld [vmem:[%s1353_s1 + $0x220] sm:$0xff]  ;;  %v96_v55 = vld [vmem:[%s1353_s1 + $0x228] sm:$0xff]  ;;  %192 = vmatprep.mubr.f32.mxu0 %v22_v49  ;;  %v908_v43 = vmov 0.0   ;;  %vm374_vm0 = vcmask 261120  }
  0x28   :  { %v23_v56 = vld [vmem:[%s1352_s0 + $0x40] sm:$0xff]  ;;  %v113_v57 = vld [vmem:[%s1353_s1 + $0x2b0] sm:$0xff]  ;;  %v114_v58 = vld [vmem:[%s1353_s1 + $0x2b8] sm:$0xff]  ;;  %267 = vmatprep.mubr.f32.mxu1 %v24_v50  ;;  %v834_v60 = vpack.c.bf16 %v96_v55, %v95_v54 }
  0x29   :  { %v20_v59 = vld [vmem:[%s1352_s0 + $0x28] sm:$0xff]  ;;  %193 = vmatmul.mubr.f32.gmra.mrb[2].mxu0 %v21_v52  ;;  %v836_v61 = vpack.c.bf16 %v114_v58, %v113_v57  ;;  %v97_v62 = vld [vmem:[%s1353_s1 + $0x230] sm:$0xff]  ;;  %v98_v63 = vld [vmem:[%s1353_s1 + $0x238] sm:$0xff] }
  0x2a   :  { %831 = vmatpush3.bf16.msra.mxu0 %v830_v51  ;;  %268 = vmatmul.mubr.f32.gmra.mrb[2].mxu1 %v23_v56  ;;  %v115_v0 = vld [vmem:[%s1353_s1 + $0x2c0] sm:$0xff]  ;;  %v116_v1 = vld [vmem:[%s1353_s1 + $0x2c8] sm:$0xff]  ;;  %v838_v2 = vpack.c.bf16 %v98_v63, %v97_v62  ;;  %v117_v6 = vld [vmem:[%s1353_s1 + $0x2d0] sm:$0xff] }
  0x2b   :  { %833 = vmatprep.subr.bf16.mxu0 %v832_v53  ;;  %337 = vmatprep.mubr.f32.mxu0 %v20_v59  ;;  %v840_v3 = vpack.c.bf16 %v116_v1, %v115_v0  ;;  %v99_v4 = vld [vmem:[%s1353_s1 + $0x240] sm:$0xff]  ;;  %v100_v5 = vld [vmem:[%s1353_s1 + $0x248] sm:$0xff]  ;;  %v118_v7 = vld [vmem:[%s1353_s1 + $0x2d8] sm:$0xff] }
  0x2c   :  { %v842_v8 = vpack.c.bf16 %v100_v5, %v99_v4  ;;  %v844_v9 = vpack.c.bf16 %v118_v7, %v117_v6  ;;  %v101_v10 = vld [vmem:[%s1353_s1 + $0x250] sm:$0xff]  ;;  %v102_v11 = vld [vmem:[%s1353_s1 + $0x258] sm:$0xff]  ;;  %v119_v12 = vld [vmem:[%s1353_s1 + $0x2e0] sm:$0xff]  ;;  %445 = vmatprep.mubr.f32.mxu1 %v908_v43 }
  0x2d   :  { %v120_v13 = vld [vmem:[%s1353_s1 + $0x2e8] sm:$0xff]  ;;  %v846_v14 = vpack.c.bf16 %v102_v11, %v101_v10  ;;  %v103_v16 = vld [vmem:[%s1353_s1 + $0x260] sm:$0xff]  ;;  %v121_v18 = vld [vmem:[%s1353_s1 + $0x2f0] sm:$0xff] }
  0x2e   :  { %835 = vmatpush3.bf16.msra.mxu0 %v834_v60  ;;  %v848_v15 = vpack.c.bf16 %v120_v13, %v119_v12  ;;  %v104_v17 = vld [vmem:[%s1353_s1 + $0x268] sm:$0xff]  ;;  %v122_v19 = vld [vmem:[%s1353_s1 + $0x2f8] sm:$0xff]  ;;  %v105_v22 = vld [vmem:[%s1353_s1 + $0x270] sm:$0xff] }
  0x2f   :  { %837 = vmatprep.subr.bf16.mxu0 %v836_v61  ;;  %v850_v20 = vpack.c.bf16 %v104_v17, %v103_v16  ;;  %v852_v21 = vpack.c.bf16 %v122_v19, %v121_v18  ;;  %v106_v23 = vld [vmem:[%s1353_s1 + $0x278] sm:$0xff]  ;;  %v19_v25 = vld [vmem:[%s1352_s0 + $0x20] sm:$0xff]  ;;  %v25_v27 = vld [vmem:[%s1352_s0 + $0x50] sm:$0xff] }
  0x30   :  { %v854_v24 = vpack.c.bf16 %v106_v23, %v105_v22  ;;  %v26_v26 = vld [vmem:[%s1352_s0 + $0x58] sm:$0xff]  ;;  %v351_v28 = vld [vmem:[%s1354_s2 + $0x8] sm:$0xff]  ;;  %v350_v31 = vld [vmem:[%s1354_s2] sm:$0xff] }
  0x31   :  { %v357_v29 = vld [vmem:[%s1354_s2 + $0x38] sm:$0xff]  ;;  %v356_v32 = vld [vmem:[%s1354_s2 + $0x30] sm:$0xff]  ;;  %v363_v34 = vld [vmem:[%s1354_s2 + $0x68] sm:$0xff] }
  0x32   :  { %839 = vmatpush3.bf16.msra.mxu0 %v838_v2  ;;  %v856_v30 = vpack.c.bf16 %v357_v29, %v351_v28  ;;  %v858_v33 = vpack.c.bf16 %v356_v32, %v350_v31  ;;  %v369_v35 = vld [vmem:[%s1354_s2 + $0x98] sm:$0xff]  ;;  %v362_v37 = vld [vmem:[%s1354_s2 + $0x60] sm:$0xff]  ;;  %v368_v38 = vld [vmem:[%s1354_s2 + $0x90] sm:$0xff] }
  0x33   :  { %841 = vmatprep.subr.bf16.mxu0 %v840_v3  ;;  %v860_v36 = vpack.c.bf16 %v369_v35, %v363_v34  ;;  %v862_v39 = vpack.c.bf16 %v368_v38, %v362_v37  ;;  %v353_v40 = vld [vmem:[%s1354_s2 + $0x18] sm:$0xff]  ;;  %v359_v41 = vld [vmem:[%s1354_s2 + $0x48] sm:$0xff]  ;;  %v352_v61 = vld [vmem:[%s1354_s2 + $0x10] sm:$0xff] }
  0x34   :  { %857 = vmatprep.subr.bf16.mxu1 %v856_v30  ;;  %v864_v42 = vpack.c.bf16 %v359_v41, %v353_v40  ;;  %v358_v62 = vld [vmem:[%s1354_s2 + $0x40] sm:$0xff]  ;;  %v365_v63 = vld [vmem:[%s1354_s2 + $0x78] sm:$0xff]  ;;  %v371_v0 = vld [vmem:[%s1354_s2 + $0xa8] sm:$0xff] }
  0x35   :  { %859 = vmatpush1.bf16.msra.mxu1 %v858_v33  ;;  %v866_v4 = vpack.c.bf16 %v358_v62, %v352_v61  ;;  %v868_v7 = vpack.c.bf16 %v371_v0, %v365_v63  ;;  %v355_v10 = vld [vmem:[%s1354_s2 + $0x28] sm:$0xff]  ;;  %v361_v11 = vld [vmem:[%s1354_s2 + $0x58] sm:$0xff]  ;;  %v354_v16 = vld [vmem:[%s1354_s2 + $0x20] sm:$0xff] }
  0x36   :  { %843 = vmatpush3.bf16.msra.mxu0 %v842_v8  ;;  %861 = vmatprep.subr.bf16.mxu1 %v860_v36  ;;  %v364_v8 = vld [vmem:[%s1354_s2 + $0x70] sm:$0xff]  ;;  %v367_v18 = vld [vmem:[%s1354_s2 + $0x88] sm:$0xff]  ;;  %v373_v19 = vld [vmem:[%s1354_s2 + $0xb8] sm:$0xff] }
  0x37   :  { %845 = vmatprep.subr.bf16.mxu0 %v844_v9  ;;  %v370_v9 = vld [vmem:[%s1354_s2 + $0xa0] sm:$0xff]  ;;  %v360_v17 = vld [vmem:[%s1354_s2 + $0x50] sm:$0xff] }
  0x38   :  { %v870_v13 = vpack.c.bf16 %v370_v9, %v364_v8  ;;  %v366_v22 = vld [vmem:[%s1354_s2 + $0x80] sm:$0xff]  ;;  %v372_v23 = vld [vmem:[%s1354_s2 + $0xb0] sm:$0xff]  ;;  %s909_s2 = smov [#allocation2]  }
  0x39   :  { %863 = vmatpush1.bf16.msra.mxu1 %v862_v39  ;;  %s629_s29 = sshll.u32 %s909_s2, 4  ;;  %s630_s29 = int_to_ptr.vmem [resolvable:$true] %s629_s29 }
  0x3a   :  { %847 = vmatpush3.bf16.msra.mxu0 %v846_v14  ;;  %865 = vmatprep.subr.bf16.mxu1 %v864_v42  ;;  %s884_s30 = scalar_lea.vmem %s630_s29, 1536  ;;  %p889_p1 = scmp.lt.s32.totalorder %s630_s29, %s630_s29 }
  0x3b   :  { %849 = vmatprep.subr.bf16.mxu0 %v848_v15  ;;  %v872_v15 = vpack.c.bf16 %v361_v11, %v355_v10  ;;  %p885_p0 = scmp.ne.s32.totalorder %s630_s29, %s884_s30  ;;  %p890_p2 = scmp.lt.s32.totalorder %s884_s30, %s884_s30 }
  0x3d   :  { %p891_p3 = por %p890_p2, %p889_p1 }
  0x3e   :  { %851 = vmatpush3.bf16.msra.mxu0 %v850_v20  ;;  %v874_v20 = vpack.c.bf16 %v360_v17, %v354_v16 }
  0x3f   :  { %853 = vmatprep.subr.bf16.mxu0 %v852_v21  ;;  %v876_v21 = vpack.c.bf16 %v373_v19, %v367_v18  ;;  %p892_p4 = pnand %p891_p3, %p885_p0 }
  0x42   :  { %855 = vmatpush3.bf16.msra.mxu0 %v854_v24  ;;  %v878_v24 = vpack.c.bf16 %v372_v23, %v366_v22 }
  0x45   :  { %338 = vmatmul.mubr.f32.vlgmr.msra.gmra.mrb[4].mxu0 %v19_v25 }
  0x46   :  { %342 = vmatprep.mubr.f32.mxu0 %v26_v26 }
  0x49   :  { %343 = vmatmul.mubr.f32.gmra.mrb[6].mxu0 %v25_v27 }
  0xf8   :  { %v678_v44 = vpop.f32.mrb[0].mxu0 }
  0xf9   :  { %v716_v45 = vpop.f32.mrb[0].mxu1  ;;  %v679_v46 = vpop.f32.mrb[1].mxu0 }
  0xfa   :  { %v680_v47 = vadd.f32 %v679_v46, %v678_v44  ;;  %v717_v48 = vpop.f32.mrb[1].mxu1 }
  0xfb   :  { %v718_v49 = vadd.f32 %v717_v48, %v716_v45 }
  0xfc   :  { %v681_v50 = vpop.f32.mrb[2].mxu0 }
  0xfd   :  { %v265_v51 = vadd.f32 %v718_v49, %v680_v47  ;;  %v719_v52 = vpop.f32.mrb[2].mxu1  ;;  %v682_v53 = vpop.f32.mrb[3].mxu0 }
  0xfe   :  { %v683_v54 = vadd.f32 %v682_v53, %v681_v50  ;;  %v720_v55 = vpop.f32.mrb[3].mxu1 }
  0xff   :  { %v721_v56 = vadd.f32 %v720_v55, %v719_v52 }
 0x101   :  { %v270_v57 = vadd.f32 %v721_v56, %v683_v54 }
 0x118   :  { %v754_v58 = vpop.f32.mrb[4].mxu0 }
 0x119   :  { %v755_v59 = vpop.f32.mrb[5].mxu0 }
 0x11a   :  { %v756_v60 = vadd.f32 %v755_v59, %v754_v58 }
 0x11c   :  { %v340_v1 = vadd.f32 %v756_v60, %v265_v51  ;;  %v757_v2 = vpop.f32.mrb[6].mxu0 }
 0x11d   :  { %v758_v3 = vpop.f32.mrb[7].mxu0 }
 0x11e   :  { %v348_v5 = vmax.f32 %v340_v1, 0.0  ;;  %v759_v6 = vadd.f32 %v758_v3, %v757_v2 }
 0x120   :  { %v345_v12 = vadd.f32 %v759_v6, %v270_v57  ;;  %640 = vmatmul.mubr.msk.f32.vlgmr.msra.gmra.mrb[4].mxu1 %vm374_vm0, %v348_v5 }
 0x121   :  { %867 = vmatpush1.bf16.msra.mxu1 %v866_v4  ;;  %451 = vmatprep.mubr.f32.mxu1 %v908_v43 }
 0x122   :  { %v349_v14 = vmax.f32 %v345_v12, 0.0  ;;  %869 = vmatprep.subr.bf16.mxu1 %v868_v7 }
 0x124   :  { %641 = vmatmul.mubr.msk.f32.gmra.mrb[6].mxu1 %vm374_vm0, %v349_v14 }
 0x125   :  { %871 = vmatpush1.bf16.msra.mxu1 %v870_v13  ;;  %522 = vmatprep.mubr.f32.mxu1 %v908_v43 }
 0x126   :  { %873 = vmatprep.subr.bf16.mxu1 %v872_v15 }
 0x128   :  { %642 = vmatmul.mubr.msk.f32.vlgmr.msra.gmra.mrb[8].mxu1 %vm374_vm0, %v348_v5 }
 0x129   :  { %875 = vmatpush1.bf16.msra.mxu1 %v874_v20  ;;  %528 = vmatprep.mubr.f32.mxu1 %v908_v43 }
 0x12a   :  { %877 = vmatprep.subr.bf16.mxu1 %v876_v21 }
 0x12c   :  { %643 = vmatmul.mubr.msk.f32.gmra.mrb[10].mxu1 %vm374_vm0, %v349_v14 }
 0x12d   :  { %879 = vmatpush1.bf16.msra.mxu1 %v878_v24  ;;  %599 = vmatprep.mubr.f32.mxu1 %v908_v43 }
 0x130   :  { %644 = vmatmul.mubr.msk.f32.vlgmr.msra.gmra.mrb[12].mxu1 %vm374_vm0, %v348_v5 }
 0x131   :  { %605 = vmatprep.mubr.f32.mxu1 %v908_v43 }
 0x134   :  { %645 = vmatmul.mubr.msk.f32.gmra.mrb[14].mxu1 %vm374_vm0, %v349_v14 }
 0x1f3   :  { %v447_v25 = vpop.f32.mrb[4].mxu1 }
 0x1f4   :  { %612 = vst [vmem:[#allocation2] sm:$0xff] %v447_v25  ;;  %v449_v26 = vpop.f32.mrb[5].mxu1 }
 0x1f5   :  { %613 = vst [vmem:[#allocation2 + $0x8] sm:$0xff] %v449_v26 }
 0x1f7   :  { %v453_v27 = vpop.f32.mrb[6].mxu1 }
 0x1f8   :  { %618 = vst [vmem:[#allocation2 + $0x30] sm:$0xff] %v453_v27  ;;  %v455_v28 = vpop.f32.mrb[7].mxu1 }
 0x1f9   :  { %619 = vst [vmem:[#allocation2 + $0x38] sm:$0xff] %v455_v28 }
 0x1fb   :  { %v524_v29 = vpop.f32.mrb[8].mxu1 }
 0x1fc   :  { %614 = vst [vmem:[#allocation2 + $0x10] sm:$0xff] %v524_v29  ;;  %v526_v30 = vpop.f32.mrb[9].mxu1 }
 0x1fd   :  { %615 = vst [vmem:[#allocation2 + $0x18] sm:$0xff] %v526_v30 }
 0x1ff   :  { %v530_v31 = vpop.f32.mrb[10].mxu1 }
 0x200   :  { %620 = vst [vmem:[#allocation2 + $0x40] sm:$0xff] %v530_v31  ;;  %v532_v32 = vpop.f32.mrb[11].mxu1 }
 0x201   :  { %621 = vst [vmem:[#allocation2 + $0x48] sm:$0xff] %v532_v32 }
 0x203   :  { %v601_v33 = vpop.f32.mrb[12].mxu1 }
 0x204   :  { %616 = vst [vmem:[#allocation2 + $0x20] sm:$0xff] %v601_v33  ;;  %v603_v34 = vpop.f32.mrb[13].mxu1 }
 0x205   :  { %617 = vst [vmem:[#allocation2 + $0x28] sm:$0xff] %v603_v34 }
 0x207   :  { %v607_v35 = vpop.f32.mrb[14].mxu1 }
 0x208   :  { %622 = vst [vmem:[#allocation2 + $0x50] sm:$0xff] %v607_v35  ;;  %v609_v36 = vpop.f32.mrb[15].mxu1 }
 0x209   :  { %623 = vst [vmem:[#allocation2 + $0x58] sm:$0xff] %v609_v36 }
 0x20a   :  { %895 = shalt.err (!%p892_p4)
}
 0x20b   :  { %s896_s6 = scalar_lea.hbm %s1355_s3, 1536 }
 0x20c   :  { %p897_p5 = scmp.ne.s32.totalorder %s1355_s3, %s896_s6  ;;  %p900_p6 = scmp.lt.u32.totalorder %s896_s6, %s1355_s3 }
 0x20e   :  { %p902_p7 = pnand %p900_p6, %p897_p5 }
 0x210   :  { %905 = shalt.err (!%p902_p7)
}
 0x211   :  { %s910_s11 = smov 768   ;;  %s911_s1 = smov 48  }
 0x212   :  { %635 = dma.vmem_to_hbm [thread:$0]  %s630_s29, 1536, %s1355_s3, [#allocation3], %s910_s11, %s910_s11, %s911_s1  }
 0x213   :  { %906 = dma.done.wait [#allocation3], 1536  }
 0x214   :  { %907 = vsyncadd [#allocation3], 4294965760 }
 0x215   :  { %639 = vsyncpa [#allocation3], 1 }

</bundles_post_ra>
